<compile_context>
chip_gen: v7x
topology: tpu7x:2x2x1
jax: 0.10.0
libtpu: 0.0.40
codegen_flags: <defaults>
</compile_context>

<pallas_src>
import jax
import jax.numpy as jnp
from jax.experimental import pallas as pl
from jax.experimental.pallas import tpu as pltpu

_LANE = 128
_WIDTHS = (1024, 512, 256, 128)          # candidate lane-dense last dims
_TARGET_BLOCK_ELEMS = 512 * 1024         # ~2 MiB f32 per VMEM buffer


def _mish_kernel(x_ref, o_ref):
    # Upcast in-register only; HBM/DMA traffic stays at the storage dtype.
    xf = x_ref[...].astype(jnp.float32)
    # tanh(softplus(x)) == u*(u+2) / (u*(u+2) + 2), u = exp(x); clamp the
    # exponent at the PyTorch softplus threshold (20) to avoid overflow.
    u = jnp.exp(jnp.minimum(xf, 20.0))
    num = u * (u + 2.0)
    t = num / (num + 2.0)                      # exact divide (tolerance-safe)
    y = jnp.where(xf > 20.0, xf, xf * t)       # identity region for x > 20
    o_ref[...] = y.astype(o_ref.dtype)


def _choose_width(n):
    """Widest lane-dense last dim dividing n; fall back to pad-to-128."""
    for w in _WIDTHS:
        if n % w == 0:
            return w, 0
    return _LANE, (-n) % _LANE


def _choose_block_rows(rows, width):
    """Block row-count: ~_TARGET_BLOCK_ELEMS per tile, sublane-aligned,
    capped so large inputs still get ~8 grid steps for pipelining/megacore."""
    target = max(8, _TARGET_BLOCK_ELEMS // width)
    if rows <= target:
        # Full-extent row block is always a legal block shape.
        return rows
    br = min(target, pl.cdiv(rows, 8))
    return max(8, (br // 8) * 8)


def mish(x):
    """Elementwise Mish.  Do NOT pre-cast bf16 inputs to f32 -- the kernel
    upcasts in-register, keeping HBM traffic at the narrow dtype."""
    orig_shape = x.shape
    orig_dtype = x.dtype

    flat = x.reshape(-1)
    n = flat.shape[0]

    width, pad = _choose_width(n)
    if pad:
        flat = jnp.pad(flat, (0, pad))
    rows = (n + pad) // width
    x2d = flat.reshape(rows, width)

    br = _choose_block_rows(rows, width)
    grid = (pl.cdiv(rows, br),)

    out2d = pl.pallas_call(
        _mish_kernel,
        out_shape=jax.ShapeDtypeStruct((rows, width), orig_dtype),
        grid_spec=pltpu.PrefetchScalarGridSpec(
            num_scalar_prefetch=0,
            grid=grid,
            in_specs=[pl.BlockSpec((br, width), lambda i: (i, 0))],
            out_specs=pl.BlockSpec((br, width), lambda i: (i, 0)),
        ),
        compiler_params=pltpu.CompilerParams(
            dimension_semantics=("parallel",)
        ),
    )(x2d)

    if pad:
        return out2d.reshape(-1)[:n].reshape(orig_shape)
    return out2d.reshape(orig_shape)


def mish_ref(x):
    # Straightforward formula: validates the algebraic collapse in-kernel.
    xf = x.astype(jnp.float32)
    sp = jnp.where(xf > 20.0, xf, jnp.log1p(jnp.exp(jnp.minimum(xf, 20.0))))
    return (xf * jnp.tanh(sp)).astype(x.dtype)


if __name__ == "__main__":
    key = jax.random.PRNGKey(0)
    # Small NCHW input, consistent with the PyTorch module's typical usage.
    x = jax.random.normal(key, (2, 4, 16, 16), dtype=jnp.float32) * 5.0

    y = mish(x)
    jax.block_until_ready(y)

    y_ref = mish_ref(x)
    assert y.shape == x.shape and y.dtype == x.dtype
    assert jnp.allclose(y, y_ref, atol=1e-5, rtol=1e-5)

    # Non-128-multiple size exercises the pad/slice path.
    x2 = jax.random.normal(jax.random.PRNGKey(1), (3, 5, 7), dtype=jnp.float32) * 5.0
    y2 = mish(x2)
    jax.block_until_ready(y2)
    assert jnp.allclose(y2, mish_ref(x2), atol=1e-5, rtol=1e-5)

    # bf16 input stays bf16 through HBM/DMA (half the memory traffic).
    x3 = jax.random.normal(jax.random.PRNGKey(2), (4, 8, 64, 64),
                           dtype=jnp.bfloat16) * 5.0
    y3 = mish(x3)
    jax.block_until_ready(y3)
    assert y3.dtype == jnp.bfloat16
    assert jnp.allclose(y3.astype(jnp.float32), mish_ref(x3).astype(jnp.float32),
                        atol=2e-2, rtol=2e-2)

    print("KERNEL_OK")
</pallas_src>

<mosaic_0001>
module attributes {stable_mosaic.version = 11 : i64} {
  func.func @_mish_kernel(%arg0: i32, %arg1: memref<2x1024xf32, #tpu.memory_space<vmem>>, %arg2: memref<2x1024xf32, #tpu.memory_space<vmem>>) attributes {dimension_semantics = [#tpu.dimension_semantics<parallel>], iteration_bounds = array<i64: 1>, scalar_prefetch = 0 : i64, scratch_operands = 0 : i64, tpu.core_type = #tpu.core_type<tc>, window_params = [{transform_indices = @transform_0, window_bounds = array<i64: 2, 1024>}, {transform_indices = @transform_1, window_bounds = array<i64: 2, 1024>}]} {
    %c0 = arith.constant 0 : index
    %c0_0 = arith.constant 0 : index
    %0 = vector.load %arg1[%c0, %c0_0] : memref<2x1024xf32, #tpu.memory_space<vmem>>, vector<2x1024xf32>
    %cst = arith.constant 2.000000e+01 : f32
    %1 = vector.broadcast %cst : f32 to vector<2x1024xf32>
    %2 = arith.minimumf %0, %1 : vector<2x1024xf32>
    %3 = math.exp %2 : vector<2x1024xf32>
    %cst_1 = arith.constant 2.000000e+00 : f32
    %4 = vector.broadcast %cst_1 : f32 to vector<2x1024xf32>
    %5 = arith.addf %3, %4 : vector<2x1024xf32>
    %6 = arith.mulf %3, %5 : vector<2x1024xf32>
    %cst_2 = arith.constant 2.000000e+00 : f32
    %7 = vector.broadcast %cst_2 : f32 to vector<2x1024xf32>
    %8 = arith.addf %6, %7 : vector<2x1024xf32>
    %9 = arith.divf %6, %8 : vector<2x1024xf32>
    %cst_3 = arith.constant 2.000000e+01 : f32
    %10 = vector.broadcast %cst_3 : f32 to vector<2x1024xf32>
    %11 = arith.cmpf ogt, %0, %10 : vector<2x1024xf32>
    %12 = arith.mulf %0, %9 : vector<2x1024xf32>
    %13 = arith.select %11, %0, %12 : vector<2x1024xi1>, vector<2x1024xf32>
    %c0_4 = arith.constant 0 : index
    %c0_5 = arith.constant 0 : index
    %14 = vector.load %arg2[%c0_4, %c0_5] : memref<2x1024xf32, #tpu.memory_space<vmem>>, vector<2x1024xf32>
    tpu.vector_store %arg2[%c0_4, %c0_5], %13 {strides = array<i32>} : memref<2x1024xf32, #tpu.memory_space<vmem>>, vector<2x1024xf32>,
    return
  }
  func.func @transform_0(%arg0: i32) -> (i32, i32) {
    %c0_i32 = arith.constant 0 : i32
    %c0_i32_0 = arith.constant 0 : i32
    return %arg0, %c0_i32 : i32, i32
  }
  func.func @transform_1(%arg0: i32) -> (i32, i32) {
    %c0_i32 = arith.constant 0 : i32
    %c0_i32_0 = arith.constant 0 : i32
    return %arg0, %c0_i32 : i32, i32
  }
}

</mosaic_0001>

<bundles_post_ra>
// kernel: tpu_custom_call.1
= control target key start
LH: loop header
LB: loop body
LE: loop exit
PB: predicated region body
PF: predicated region fallthrough
CT: control target
= control target key end

     0   :  { %6 = vsyncpa [#allocation3], 0  ;;  %s156_s0 = inlined_call_operand.hbm [shape: f32[2,1024], index: 0, kind: input, shape index: {}]   ;;  %s157_s1 = inlined_call_operand.hbm [shape: f32[2,1024], index: 1, kind: output, shape index: {}]  }
   0x1   :  { %7 = vsyncpa [#allocation4], 0  ;;  %s120_s6 = smov [#allocation2]   ;;  %s72_s10 = scalar_lea.hbm %s156_s0, 256 }
   0x2   :  { %s14_s7 = sshll.u32 %s120_s6, 4  ;;  %p73_p0 = scmp.ne.s32.totalorder %s156_s0, %s72_s10  ;;  %s15_s7 = int_to_ptr.vmem [resolvable:$true] %s14_s7 }
   0x3   :  { %p76_p1 = scmp.lt.u32.totalorder %s72_s10, %s156_s0 }
   0x5   :  { %p78_p2 = pnand %p76_p1, %p73_p0 }
   0x7   :  { %81 = shalt.err (!%p78_p2)
}
   0x8   :  { %s82_s15 = scalar_lea.vmem %s15_s7, 256  ;;  %p87_p4 = scmp.lt.s32.totalorder %s15_s7, %s15_s7 }
   0x9   :  { %p83_p3 = scmp.ne.s32.totalorder %s15_s7, %s82_s15  ;;  %p88_p5 = scmp.lt.s32.totalorder %s82_s15, %s82_s15 }
   0xb   :  { %p89_p6 = por %p88_p5, %p87_p4 }
   0xd   :  { %p90_p7 = pnand %p89_p6, %p83_p3 }
   0xf   :  { %93 = shalt.err (!%p90_p7)
}
  0x10   :  { %17 = dma.hbm_to_vmem [thread:$0]  %s156_s0, 256, %s15_s7, [#allocation3]  }
  0x11   :  { %116 = dma.done.wait [#allocation3], 256  }
  0x12   :  { %117 = vsyncadd [#allocation3], 4294967040  ;;  %v21_v0 = vld [vmem:[#allocation2] sm:$0xff]  ;;  %v22_v1 = vld [vmem:[#allocation2 + $0x8] sm:$0xff]  ;;  %s121_s0 = smov [#allocation5]  }
  0x13   :  { %v23_v2 = vmin.f32 %v21_v0, 20.0  ;;  %v24_v3 = vmin.f32 %v22_v1, 20.0  ;;  %vm39_vm0 = vcmp.gt.f32.partialorder %v21_v0, 20.0  ;;  %s53_s18 = sshll.u32 %s121_s0, 4  ;;  %vm40_vm1 = vcmp.gt.f32.partialorder %v22_v1, 20.0  ;;  %s54_s18 = int_to_ptr.vmem [resolvable:$true] %s53_s18 }
  0x14   :  { %s94_s19 = scalar_lea.vmem %s54_s18, 256  ;;  %p99_p9 = scmp.lt.s32.totalorder %s54_s18, %s54_s18 }
  0x15   :  { %v25_v4 = vmul.f32 1.442695, %v23_v2  ;;  %v27_v5 = vmul.f32 1.442695, %v24_v3  ;;  %p95_p8 = scmp.ne.s32.totalorder %s54_s18, %s94_s19  ;;  %p100_p10 = scmp.lt.s32.totalorder %s94_s19, %s94_s19 }
  0x17   :  { %64 = vpow2.f32 %v25_v4  ;;  %p101_p11 = por %p100_p10, %p99_p9 }
  0x18   :  { %66 = vpow2.f32 %v27_v5 }
  0x19   :  { %p102_p12 = pnand %p101_p11, %p95_p8 }
  0x21   :  { %v65_v6 = vpop.eup %64 }
  0x22   :  { %v67_v7 = vpop.eup %66  ;;  %v29_v8 = vadd.f32 2.0, %v65_v6 }
  0x23   :  { %v30_v9 = vadd.f32 2.0, %v67_v7 }
  0x24   :  { %v31_v10 = vmul.f32 %v65_v6, %v29_v8 }
  0x25   :  { %v32_v11 = vmul.f32 %v67_v7, %v30_v9 }
  0x26   :  { %v33_v12 = vadd.f32 2.0, %v31_v10 }
  0x27   :  { %v34_v13 = vadd.f32 2.0, %v32_v11 }
  0x28   :  { %68 = vrcp.f32 %v33_v12 }
  0x29   :  { %70 = vrcp.f32 %v34_v13 }
  0x32   :  { %v69_v14 = vpop.eup %68 }
  0x33   :  { %v71_v15 = vpop.eup %70  ;;  %v36_v16 = vmul.f32 %v69_v14, %v31_v10 }
  0x34   :  { %v38_v17 = vmul.f32 %v71_v15, %v32_v11 }
  0x35   :  { %v41_v18 = vmul.f32 %v36_v16, %v21_v0 }
  0x36   :  { %v42_v19 = vmul.f32 %v38_v17, %v22_v1 }
  0x37   :  { %v43_v20 = vsel %vm39_vm0, %v21_v0, %v41_v18 }
  0x38   :  { %45 = vst [vmem:[#allocation5] sm:$0xff] %v43_v20  ;;  %v44_v21 = vsel %vm40_vm1, %v22_v1, %v42_v19 }
  0x39   :  { %46 = vst [vmem:[#allocation5 + $0x8] sm:$0xff] %v44_v21 }
  0x3a   :  { %105 = shalt.err (!%p102_p12)
}
  0x3b   :  { %s106_s22 = scalar_lea.hbm %s157_s1, 256 }
  0x3c   :  { %p107_p13 = scmp.ne.s32.totalorder %s157_s1, %s106_s22  ;;  %p110_p0 = scmp.lt.u32.totalorder %s106_s22, %s157_s1 }
  0x3e   :  { %p112_p1 = pnand %p110_p0, %p107_p13 }
  0x40   :  { %115 = shalt.err (!%p112_p1)
}
  0x41   :  { %56 = dma.vmem_to_hbm [thread:$0]  %s54_s18, 256, %s157_s1, [#allocation4]  }
  0x42   :  { %118 = dma.done.wait [#allocation4], 256  }
  0x43   :  { %119 = vsyncadd [#allocation4], 4294967040 }
  0x44   :  { %60 = vsyncpa [#allocation3], 1 }
  0x45   :  { %61 = vsyncpa [#allocation4], 1 }

</bundles_post_ra>
